<compile_context>
chip_gen: v5e
topology: v5e:2x2
jax: 0.10.0
libtpu: 0.0.40
codegen_flags: <defaults>
</compile_context>

<pallas_src>
import jax
import jax.numpy as jnp
from jax.experimental import pallas as pl
from jax.experimental.pallas import tpu as pltpu

IN_FEATURES = 784
OUT_FEATURES = 10
PADDED_OUT = 128     # lane-dense output / weight N dimension
MAX_BLOCK_B = 512    # batch tile: amortizes per-step overhead, safe for 64 MiB VMEM


def _round_up(n, m):
    return ((n + m - 1) // m) * m


def _linear_kernel(x_ref, w_ref, b_ref, o_ref):
    # x_ref: [TB, 784], w_ref: [784, 128], b_ref: [1, 128], o_ref: [TB, 128]
    # W / b blocks are grid-invariant => resident in VMEM; only x / out stream.
    acc = jnp.dot(x_ref[...], w_ref[...], preferred_element_type=jnp.float32)
    o_ref[...] = (acc + b_ref[...].astype(jnp.float32)).astype(o_ref.dtype)


def mnist_logistic_forward(x, w, b):
    """x: [B, 784], w: [784, 10], b: [10] -> [B, 10]  (== x @ w + b)."""
    B = x.shape[0]

    # Pad the tiny N dimension to a full 128-lane width (outside the kernel).
    w_p = jnp.zeros((IN_FEATURES, PADDED_OUT), w.dtype).at[:, :OUT_FEATURES].set(w)
    b_p = jnp.zeros((1, PADDED_OUT), b.dtype).at[0, :OUT_FEATURES].set(b)

    # Batch tiling (multiple of 8 sublanes). Pad B up to a whole number of tiles.
    tb = min(MAX_BLOCK_B, _round_up(B, 8))
    b_pad = _round_up(B, tb)
    if b_pad != B:
        x = jnp.pad(x, ((0, b_pad - B), (0, 0)))
    grid = (b_pad // tb,)

    cost = pl.CostEstimate(
        flops=2 * b_pad * IN_FEATURES * PADDED_OUT,
        transcendentals=0,
        bytes_accessed=(
            b_pad * IN_FEATURES * x.dtype.itemsize
            + IN_FEATURES * PADDED_OUT * w_p.dtype.itemsize
            + b_pad * PADDED_OUT * x.dtype.itemsize
        ),
    )

    out_padded = pl.pallas_call(
        _linear_kernel,
        out_shape=jax.ShapeDtypeStruct((b_pad, PADDED_OUT), x.dtype),
        grid_spec=pltpu.PrefetchScalarGridSpec(
            num_scalar_prefetch=0,
            grid=grid,
            in_specs=[
                pl.BlockSpec((tb, IN_FEATURES), lambda i: (i, 0)),          # x streams
                pl.BlockSpec((IN_FEATURES, PADDED_OUT), lambda i: (0, 0)),  # W resident
                pl.BlockSpec((1, PADDED_OUT), lambda i: (0, 0)),            # b resident
            ],
            out_specs=pl.BlockSpec((tb, PADDED_OUT), lambda i: (i, 0)),
        ),
        compiler_params=pltpu.CompilerParams(
            # Batch tiles are independent -> parallel (uses both TCs on v7x).
            dimension_semantics=("parallel",),
        ),
        cost_estimate=cost,
    )(x, w_p, b_p)

    return out_padded[:B, :OUT_FEATURES]


def init_params(key, dtype=jnp.float32):
    # nn.Linear default init: U(-1/sqrt(fan_in), +1/sqrt(fan_in)).
    kw, kb = jax.random.split(key)
    bound = 1.0 / (IN_FEATURES ** 0.5)
    w = jax.random.uniform(kw, (IN_FEATURES, OUT_FEATURES), dtype,
                           minval=-bound, maxval=bound)
    b = jax.random.uniform(kb, (OUT_FEATURES,), dtype,
                           minval=-bound, maxval=bound)
    return w, b


if __name__ == "__main__":
    key = jax.random.PRNGKey(0)
    kx, kp = jax.random.split(key)
    w, b = init_params(kp)

    # Small batch matching the module spec (bs = 64): single grid step.
    bs = 64
    x = jax.random.normal(kx, (bs, IN_FEATURES), dtype=jnp.float32)
    out = mnist_logistic_forward(x, w, b)
    jax.block_until_ready(out)
    ref = x @ w + b
    assert out.shape == (bs, OUT_FEATURES)
    assert jnp.allclose(out, ref, atol=2e-5, rtol=1e-5)

    # Larger, non-multiple batch to exercise the tiled + row-padded path (grid > 1).
    bs2 = 1152
    x2 = jax.random.normal(jax.random.PRNGKey(1), (bs2, IN_FEATURES), dtype=jnp.float32)
    out2 = mnist_logistic_forward(x2, w, b)
    jax.block_until_ready(out2)
    ref2 = x2 @ w + b
    assert out2.shape == (bs2, OUT_FEATURES)
    assert jnp.allclose(out2, ref2, atol=2e-5, rtol=1e-5)

    print("KERNEL_OK")
</pallas_src>

<mosaic_0001>
module attributes {stable_mosaic.version = 11 : i64} {
  func.func @_linear_kernel(%arg0: i32, %arg1: memref<64x784xf32, #tpu.memory_space<vmem>>, %arg2: memref<784x128xf32, #tpu.memory_space<vmem>>, %arg3: memref<1x128xf32, #tpu.memory_space<vmem>>, %arg4: memref<64x128xf32, #tpu.memory_space<vmem>>) attributes {dimension_semantics = [#tpu.dimension_semantics<parallel>], iteration_bounds = array<i64: 1>, scalar_prefetch = 0 : i64, scratch_operands = 0 : i64, tpu.core_type = #tpu.core_type<tc>, window_params = [{transform_indices = @transform_0, window_bounds = array<i64: 64, 784>}, {pipeline_mode = #tpu.pipeline_mode<synchronous>, transform_indices = @transform_1, window_bounds = array<i64: 784, 128>}, {pipeline_mode = #tpu.pipeline_mode<synchronous>, transform_indices = @transform_2, window_bounds = array<i64: 1, 128>}, {transform_indices = @transform_3, window_bounds = array<i64: 64, 128>}]} {
    %c0 = arith.constant 0 : index
    %c0_0 = arith.constant 0 : index
    %0 = vector.load %arg1[%c0, %c0_0] : memref<64x784xf32, #tpu.memory_space<vmem>>, vector<64x784xf32>
    %c0_1 = arith.constant 0 : index
    %c0_2 = arith.constant 0 : index
    %1 = vector.load %arg2[%c0_1, %c0_2] : memref<784x128xf32, #tpu.memory_space<vmem>>, vector<784x128xf32>
    %cst = arith.constant dense<0.000000e+00> : vector<64x128xf32>
    %2 = tpu.matmul %0, %1, %cst {dimension_numbers = #tpu.dot_dimension_numbers<[1], [0], [0], [1], [0, 0, 1, 1], [], []>} : vector<64x784xf32>, vector<784x128xf32>, vector<64x128xf32> -> vector<64x128xf32>
    %c0_3 = arith.constant 0 : index
    %c0_4 = arith.constant 0 : index
    %3 = vector.load %arg3[%c0_3, %c0_4] : memref<1x128xf32, #tpu.memory_space<vmem>>, vector<1x128xf32>
    %4 = vector.broadcast %3 : vector<1x128xf32> to vector<64x128xf32>
    %5 = arith.addf %2, %4 : vector<64x128xf32>
    %c0_5 = arith.constant 0 : index
    %c0_6 = arith.constant 0 : index
    %6 = vector.load %arg4[%c0_5, %c0_6] : memref<64x128xf32, #tpu.memory_space<vmem>>, vector<64x128xf32>
    tpu.vector_store %arg4[%c0_5, %c0_6], %5 {strides = array<i32>} : memref<64x128xf32, #tpu.memory_space<vmem>>, vector<64x128xf32>,
    return
  }
  func.func @transform_0(%arg0: i32) -> (i32, i32) {
    %c0_i32 = arith.constant 0 : i32
    %c0_i32_0 = arith.constant 0 : i32
    return %arg0, %c0_i32 : i32, i32
  }
  func.func @transform_1(%arg0: i32) -> (i32, i32) {
    %c0_i32 = arith.constant 0 : i32
    %c0_i32_0 = arith.constant 0 : i32
    %c0_i32_1 = arith.constant 0 : i32
    return %c0_i32, %c0_i32_0 : i32, i32
  }
  func.func @transform_2(%arg0: i32) -> (i32, i32) {
    %c0_i32 = arith.constant 0 : i32
    %c0_i32_0 = arith.constant 0 : i32
    %c0_i32_1 = arith.constant 0 : i32
    return %c0_i32, %c0_i32_0 : i32, i32
  }
  func.func @transform_3(%arg0: i32) -> (i32, i32) {
    %c0_i32 = arith.constant 0 : i32
    %c0_i32_0 = arith.constant 0 : i32
    return %arg0, %c0_i32 : i32, i32
  }
}

</mosaic_0001>

<bundles_post_ra>
// kernel: tpu_custom_call.1
= control target key start
LH: loop header
LB: loop body
LE: loop exit
PB: predicated region body
PF: predicated region fallthrough
CT: control target
= control target key end

     0   :  { %8 = vsyncpa [#allocation3], 0  ;;  %s807_s0 = inlined_call_operand.hbm [shape: f32[64,784], index: 0, kind: input, shape index: {}]   ;;  %s808_s1 = inlined_call_operand.hbm [shape: f32[784,128], index: 1, kind: input, shape index: {}]   ;;  %s809_s2 = inlined_call_operand.vmem [shape: f32[1,128], index: 2, kind: input, shape index: {}]   ;;  %s810_s3 = inlined_call_operand.hbm [shape: f32[64,128], index: 3, kind: output, shape index: {}]  }
   0x1   :  { %9 = vsyncpa [#allocation6], 0 }
   0x2   :  { %10 = vsyncpa [#allocation4], 0  ;;  %s15_s14 = sshll.u32 %s807_s0, 4  ;;  %s673_s15 = smov [#allocation2]   ;;  %s16_s14 = int_to_ptr.hbm [resolvable:$true] %s15_s14 }
   0x3   :  { %s17_s16 = sshll.u32 %s673_s15, 4  ;;  %s28_s19 = sshll.u32 %s808_s1, 4  ;;  %s18_s16 = int_to_ptr.vmem [resolvable:$true] %s17_s16  ;;  %s29_s19 = int_to_ptr.hbm [resolvable:$true] %s28_s19 }
   0x4   :  { %s674_s20 = smov 896   ;;  %s675_s21 = smov 56  }
   0x5   :  { %23 = dma.hbm_to_vmem [thread:$0]  %s16_s14, 7168, %s18_s16, [#allocation3], %s674_s20, %s674_s20, %s675_s21  }
   0x6   :  { %s676_s22 = smov [#allocation5]   ;;  %s677_s24 = smov 128  }
   0x7   :  { %s30_s23 = sshll.u32 %s676_s22, 4  ;;  %s678_s25 = smov 8   ;;  %s31_s23 = int_to_ptr.vmem [resolvable:$true] %s30_s23 }
   0x8   :  { %36 = dma.hbm_to_vmem [thread:$0]  %s29_s19, 12544, %s31_s23, [#allocation6], %s677_s24, %s677_s24, %s678_s25  }
   0x9   :  { %667 = dma.done.wait [#allocation3], 7168  }
   0xa   :  { %668 = vsyncadd [#allocation3], 4294960128 }
   0xb   :  { %669 = dma.done.wait [#allocation6], 12544  }
   0xc   :  { %670 = vsyncadd [#allocation6], 4294954752  ;;  %v118_v0 = vld [vmem:[#allocation5 + $0x78] sm:$0xff]  ;;  %v117_v3 = vld [vmem:[#allocation5 + $0x70] sm:$0xff]  ;;  %vm205_vm0 = vcmask 130048   ;;  %s531_s29 = sshll.u32 %s810_s3, 4  ;;  %s532_s29 = int_to_ptr.hbm [resolvable:$true] %s531_s29 }
   0xd   :  { %v134_v1 = vld [vmem:[#allocation5 + $0xf8] sm:$0xff]  ;;  %230 = vmatpush.msra.mxu0 %v118_v0  ;;  %553 = vmatpush.msra.mxu3 %v118_v0  ;;  %v133_v4 = vld [vmem:[#allocation5 + $0xf0] sm:$0xff]  ;;  %v116_v6 = vld [vmem:[#allocation5 + $0x68] sm:$0xff] }
   0xe   :  { %v150_v2 = vld [vmem:[#allocation5 + $0x178] sm:$0xff]  ;;  %v149_v5 = vld [vmem:[#allocation5 + $0x170] sm:$0xff]  ;;  %271 = vmatpush.msra.mxu1 %v134_v1  ;;  %v132_v7 = vld [vmem:[#allocation5 + $0xe8] sm:$0xff] }
   0xf   :  { %312 = vmatpush.msra.mxu2 %v150_v2  ;;  %231 = vmatpush.msra.mxu0 %v117_v3  ;;  %v148_v8 = vld [vmem:[#allocation5 + $0x168] sm:$0xff]  ;;  %v115_v9 = vld [vmem:[#allocation5 + $0x60] sm:$0xff]  ;;  %v114_v12 = vld [vmem:[#allocation5 + $0x58] sm:$0xff] }
  0x10   :  { %554 = vmatpush.msra.mxu3 %v117_v3  ;;  %272 = vmatpush.msra.mxu1 %v133_v4  ;;  %v131_v10 = vld [vmem:[#allocation5 + $0xe0] sm:$0xff]  ;;  %v130_v13 = vld [vmem:[#allocation5 + $0xd8] sm:$0xff]  ;;  %v113_v15 = vld [vmem:[#allocation5 + $0x50] sm:$0xff] }
  0x11   :  { %313 = vmatpush.msra.mxu2 %v149_v5  ;;  %232 = vmatpush.msra.mxu0 %v116_v6  ;;  %v147_v11 = vld [vmem:[#allocation5 + $0x160] sm:$0xff]  ;;  %v146_v14 = vld [vmem:[#allocation5 + $0x158] sm:$0xff]  ;;  %v129_v16 = vld [vmem:[#allocation5 + $0xd0] sm:$0xff] }
  0x12   :  { %555 = vmatpush.msra.mxu3 %v116_v6  ;;  %273 = vmatpush.msra.mxu1 %v132_v7  ;;  %v145_v17 = vld [vmem:[#allocation5 + $0x150] sm:$0xff]  ;;  %v112_v18 = vld [vmem:[#allocation5 + $0x48] sm:$0xff]  ;;  %v111_v21 = vld [vmem:[#allocation5 + $0x40] sm:$0xff] }
  0x13   :  { %314 = vmatpush.msra.mxu2 %v148_v8  ;;  %233 = vmatpush.msra.mxu0 %v115_v9  ;;  %v128_v19 = vld [vmem:[#allocation5 + $0xc8] sm:$0xff]  ;;  %v127_v22 = vld [vmem:[#allocation5 + $0xc0] sm:$0xff]  ;;  %v110_v24 = vld [vmem:[#allocation5 + $0x38] sm:$0xff] }
  0x14   :  { %556 = vmatpush.msra.mxu3 %v115_v9  ;;  %274 = vmatpush.msra.mxu1 %v131_v10  ;;  %v144_v20 = vld [vmem:[#allocation5 + $0x148] sm:$0xff]  ;;  %v143_v23 = vld [vmem:[#allocation5 + $0x140] sm:$0xff]  ;;  %v126_v25 = vld [vmem:[#allocation5 + $0xb8] sm:$0xff] }
  0x15   :  { %315 = vmatpush.msra.mxu2 %v147_v11  ;;  %234 = vmatpush.msra.mxu0 %v114_v12  ;;  %v142_v26 = vld [vmem:[#allocation5 + $0x138] sm:$0xff]  ;;  %v109_v27 = vld [vmem:[#allocation5 + $0x30] sm:$0xff]  ;;  %v108_v30 = vld [vmem:[#allocation5 + $0x28] sm:$0xff] }
  0x16   :  { %557 = vmatpush.msra.mxu3 %v114_v12  ;;  %275 = vmatpush.msra.mxu1 %v130_v13  ;;  %v125_v28 = vld [vmem:[#allocation5 + $0xb0] sm:$0xff]  ;;  %v124_v31 = vld [vmem:[#allocation5 + $0xa8] sm:$0xff]  ;;  %v107_v33 = vld [vmem:[#allocation5 + $0x20] sm:$0xff] }
  0x17   :  { %316 = vmatpush.msra.mxu2 %v146_v14  ;;  %235 = vmatpush.msra.mxu0 %v113_v15  ;;  %v141_v29 = vld [vmem:[#allocation5 + $0x130] sm:$0xff]  ;;  %v140_v32 = vld [vmem:[#allocation5 + $0x128] sm:$0xff]  ;;  %v123_v34 = vld [vmem:[#allocation5 + $0xa0] sm:$0xff] }
  0x18   :  { %558 = vmatpush.msra.mxu3 %v113_v15  ;;  %276 = vmatpush.msra.mxu1 %v129_v16  ;;  %v139_v35 = vld [vmem:[#allocation5 + $0x120] sm:$0xff]  ;;  %v106_v36 = vld [vmem:[#allocation5 + $0x18] sm:$0xff]  ;;  %v105_v39 = vld [vmem:[#allocation5 + $0x10] sm:$0xff] }
  0x19   :  { %317 = vmatpush.msra.mxu2 %v145_v17  ;;  %236 = vmatpush.msra.mxu0 %v112_v18  ;;  %v122_v37 = vld [vmem:[#allocation5 + $0x98] sm:$0xff]  ;;  %v121_v40 = vld [vmem:[#allocation5 + $0x90] sm:$0xff]  ;;  %v104_v42 = vld [vmem:[#allocation5 + $0x8] sm:$0xff] }
  0x1a   :  { %559 = vmatpush.msra.mxu3 %v112_v18  ;;  %277 = vmatpush.msra.mxu1 %v128_v19  ;;  %v138_v38 = vld [vmem:[#allocation5 + $0x118] sm:$0xff]  ;;  %v137_v41 = vld [vmem:[#allocation5 + $0x110] sm:$0xff]  ;;  %v120_v43 = vld [vmem:[#allocation5 + $0x88] sm:$0xff] }
  0x1b   :  { %318 = vmatpush.msra.mxu2 %v144_v20  ;;  %237 = vmatpush.msra.mxu0 %v111_v21  ;;  %v136_v44 = vld [vmem:[#allocation5 + $0x108] sm:$0xff]  ;;  %v103_v45 = vld [vmem:[#allocation5] sm:$0xff]  ;;  %v49_v51 = vld [vmem:[#allocation2 + $0x10] sm:$0xff] }
  0x1c   :  { %560 = vmatpush.msra.mxu3 %v111_v21  ;;  %278 = vmatpush.msra.mxu1 %v127_v22  ;;  %v119_v46 = vld [vmem:[#allocation5 + $0x80] sm:$0xff]  ;;  %v48_v50 = vld [vmem:[#allocation2 + $0x8] sm:$0xff]  ;;  %v166_v52 = vld [vmem:[#allocation5 + $0x1f8] sm:$0xff] }
  0x1d   :  { %319 = vmatpush.msra.mxu2 %v143_v23  ;;  %238 = vmatpush.msra.mxu0 %v110_v24  ;;  %v135_v47 = vld [vmem:[#allocation5 + $0x100] sm:$0xff]  ;;  %v709_v53 = vld [vmem:[#allocation5 + $0x308] sm:$0xff]  ;;  %v182_v54 = vld [vmem:[#allocation5 + $0x278] sm:$0xff] }
  0x1e   :  { %561 = vmatpush.msra.mxu3 %v110_v24  ;;  %279 = vmatpush.msra.mxu1 %v126_v25  ;;  %v47_v48 = vld [vmem:[#allocation2] sm:$0xff]  ;;  %v711_v55 = vld [vmem:[#allocation5 + $0x2f8] sm:$0xff]  ;;  %v165_v56 = vld [vmem:[#allocation5 + $0x1f0] sm:$0xff] }
  0x1f   :  { %320 = vmatpush.msra.mxu2 %v142_v26  ;;  %239 = vmatpush.msra.mxu0 %v109_v27  ;;  %v75_v49 = vld [vmem:[#allocation2 + $0xe0] sm:$0xff]  ;;  %v181_v57 = vld [vmem:[#allocation5 + $0x270] sm:$0xff]  ;;  %v164_v59 = vld [vmem:[#allocation5 + $0x1e8] sm:$0xff] }
  0x20   :  { %562 = vmatpush.msra.mxu3 %v109_v27  ;;  %280 = vmatpush.msra.mxu1 %v125_v28  ;;  %v714_v58 = vld [vmem:[#allocation5 + $0x2f0] sm:$0xff]  ;;  %v180_v60 = vld [vmem:[#allocation5 + $0x268] sm:$0xff]  ;;  %v163_v62 = vld [vmem:[#allocation5 + $0x1e0] sm:$0xff] }
  0x21   :  { %321 = vmatpush.msra.mxu2 %v141_v29  ;;  %240 = vmatpush.msra.mxu0 %v108_v30  ;;  %v717_v61 = vld [vmem:[#allocation5 + $0x2e8] sm:$0xff]  ;;  %v54_v63 = vld [vmem:[#allocation2 + $0x38] sm:$0xff]  ;;  %v720_v0 = vld [vmem:[#allocation5 + $0x300] sm:$0xff] }
  0x22   :  { %563 = vmatpush.msra.mxu3 %v108_v30  ;;  %281 = vmatpush.msra.mxu1 %v124_v31  ;;  %v179_v1 = vld [vmem:[#allocation5 + $0x260] sm:$0xff]  ;;  %v82_v2 = vld [vmem:[#allocation2 + $0x118] sm:$0xff]  ;;  %v56_v4 = vld [vmem:[#allocation2 + $0x48] sm:$0xff] }
  0x23   :  { %322 = vmatpush.msra.mxu2 %v140_v32  ;;  %241 = vmatpush.msra.mxu0 %v107_v33  ;;  %v55_v3 = vld [vmem:[#allocation2 + $0x40] sm:$0xff]  ;;  %v162_v5 = vld [vmem:[#allocation5 + $0x1d8] sm:$0xff]  ;;  %v161_v8 = vld [vmem:[#allocation5 + $0x1d0] sm:$0xff] }
  0x24   :  { %564 = vmatpush.msra.mxu3 %v107_v33  ;;  %282 = vmatpush.msra.mxu1 %v123_v34  ;;  %v178_v6 = vld [vmem:[#allocation5 + $0x258] sm:$0xff]  ;;  %v724_v7 = vld [vmem:[#allocation5 + $0x2e0] sm:$0xff]  ;;  %v177_v9 = vld [vmem:[#allocation5 + $0x250] sm:$0xff] }
  0x25   :  { %323 = vmatpush.msra.mxu2 %v139_v35  ;;  %242 = vmatpush.msra.mxu0 %v106_v36  ;;  %v726_v10 = vld [vmem:[#allocation5 + $0x2d8] sm:$0xff]  ;;  %v160_v11 = vld [vmem:[#allocation5 + $0x1c8] sm:$0xff]  ;;  %v61_v13 = vld [vmem:[#allocation2 + $0x70] sm:$0xff] }
  0x26   :  { %565 = vmatpush.msra.mxu3 %v106_v36  ;;  %283 = vmatpush.msra.mxu1 %v122_v37  ;;  %v176_v12 = vld [vmem:[#allocation5 + $0x248] sm:$0xff]  ;;  %v729_v14 = vld [vmem:[#allocation5 + $0x2d0] sm:$0xff]  ;;  %v159_v15 = vld [vmem:[#allocation5 + $0x1c0] sm:$0xff] }
  0x27   :  { %324 = vmatpush.msra.mxu2 %v138_v38  ;;  %243 = vmatpush.msra.mxu0 %v105_v39  ;;  %v175_v16 = vld [vmem:[#allocation5 + $0x240] sm:$0xff]  ;;  %v89_v17 = vld [vmem:[#allocation2 + $0x150] sm:$0xff]  ;;  %v62_v18 = vld [vmem:[#allocation2 + $0x78] sm:$0xff] }
  0x28   :  { %566 = vmatpush.msra.mxu3 %v105_v39  ;;  %284 = vmatpush.msra.mxu1 %v121_v40  ;;  %v63_v19 = vld [vmem:[#allocation2 + $0x80] sm:$0xff]  ;;  %v158_v20 = vld [vmem:[#allocation5 + $0x1b8] sm:$0xff]  ;;  %v733_v22 = vld [vmem:[#allocation5 + $0x2c8] sm:$0xff] }
  0x29   :  { %325 = vmatpush.msra.mxu2 %v137_v41  ;;  %244 = vmatpush.msra.mxu0 %v104_v42  ;;  %v174_v21 = vld [vmem:[#allocation5 + $0x238] sm:$0xff]  ;;  %v157_v23 = vld [vmem:[#allocation5 + $0x1b0] sm:$0xff]  ;;  %v735_v25 = vld [vmem:[#allocation5 + $0x2c0] sm:$0xff] }
  0x2a   :  { %567 = vmatpush.msra.mxu3 %v104_v42  ;;  %285 = vmatpush.msra.mxu1 %v120_v43  ;;  %v173_v24 = vld [vmem:[#allocation5 + $0x230] sm:$0xff]  ;;  %v156_v26 = vld [vmem:[#allocation5 + $0x1a8] sm:$0xff]  ;;  %v738_v28 = vld [vmem:[#allocation5 + $0x2b8] sm:$0xff] }
  0x2b   :  { %326 = vmatpush.msra.mxu2 %v136_v44  ;;  %245 = vmatpush.msra.mxu0 %v103_v45  ;;  %v172_v27 = vld [vmem:[#allocation5 + $0x228] sm:$0xff]  ;;  %v155_v29 = vld [vmem:[#allocation5 + $0x1a0] sm:$0xff]  ;;  %v69_v33 = vld [vmem:[#allocation2 + $0xb0] sm:$0xff] }
  0x2c   :  { %568 = vmatpush.msra.mxu3 %v103_v45  ;;  %286 = vmatpush.msra.mxu1 %v119_v46  ;;  %v68_v30 = vld [vmem:[#allocation2 + $0xa8] sm:$0xff]  ;;  %v171_v31 = vld [vmem:[#allocation5 + $0x220] sm:$0xff]  ;;  %v70_v34 = vld [vmem:[#allocation2 + $0xb8] sm:$0xff] }
  0x2d   :  { %327 = vmatpush.msra.mxu2 %v135_v47  ;;  %246 = vmatmul.f32.vlgmr.msra.gmra.mxu0 %v47_v48  ;;  %v96_v32 = vld [vmem:[#allocation2 + $0x188] sm:$0xff]  ;;  %v154_v35 = vld [vmem:[#allocation5 + $0x198] sm:$0xff]  ;;  %v742_v37 = vld [vmem:[#allocation5 + $0x2b0] sm:$0xff] }
  0x2e   :  { %258 = vmatmul.f32.vlgmr.msra.gmra.mxu3 %v75_v49  ;;  %287 = vmatmul.f32.vlgmr.msra.gmra.mxu1 %v48_v50  ;;  %v170_v36 = vld [vmem:[#allocation5 + $0x218] sm:$0xff]  ;;  %v153_v38 = vld [vmem:[#allocation5 + $0x190] sm:$0xff]  ;;  %v744_v40 = vld [vmem:[#allocation5 + $0x2a8] sm:$0xff] }
  0x2f   :  { %328 = vmatmul.f32.vlgmr.msra.gmra.mxu2 %v49_v51  ;;  %353 = vmatpush.msrb.mxu3 %v166_v52  ;;  %v169_v39 = vld [vmem:[#allocation5 + $0x210] sm:$0xff]  ;;  %v152_v41 = vld [vmem:[#allocation5 + $0x188] sm:$0xff]  ;;  %v747_v43 = vld [vmem:[#allocation5 + $0x2a0] sm:$0xff] }
  0x30   :  { %490 = vmatpush.msrb.mxu2 %v709_v53  ;;  %394 = vmatpush.msrb.mxu0 %v182_v54  ;;  %v168_v42 = vld [vmem:[#allocation5 + $0x208] sm:$0xff]  ;;  %v151_v44 = vld [vmem:[#allocation5 + $0x180] sm:$0xff]  ;;  %v77_v47 = vld [vmem:[#allocation2 + $0xf0] sm:$0xff] }
  0x31   :  { %569 = vmatpush.msrb.mxu1 %v711_v55  ;;  %354 = vmatpush.msrb.mxu3 %v165_v56  ;;  %v167_v45 = vld [vmem:[#allocation5 + $0x200] sm:$0xff]  ;;  %v76_v46 = vld [vmem:[#allocation2 + $0xe8] sm:$0xff]  ;;  %v50_v48 = vld [vmem:[#allocation2 + $0x18] sm:$0xff] }
  0x32   :  { %395 = vmatpush.msrb.mxu0 %v181_v57  ;;  %491 = vmatpush.msrb.mxu2 %v720_v0  ;;  %v51_v49 = vld [vmem:[#allocation2 + $0x20] sm:$0xff]  ;;  %v186_v50 = vld [vmem:[#allocation5 + $0x298] sm:$0xff]  ;;  %v185_v51 = vld [vmem:[#allocation5 + $0x290] sm:$0xff] }
  0x33   :  { %570 = vmatpush.msrb.mxu1 %v714_v58  ;;  %355 = vmatpush.msrb.mxu3 %v164_v59  ;;  %v184_v52 = vld [vmem:[#allocation5 + $0x288] sm:$0xff]  ;;  %v83_v54 = vld [vmem:[#allocation2 + $0x120] sm:$0xff]  ;;  %v57_v57 = vld [vmem:[#allocation2 + $0x50] sm:$0xff] }
  0x34   :  { %396 = vmatpush.msrb.mxu0 %v180_v60  ;;  %v84_v56 = vld [vmem:[#allocation2 + $0x128] sm:$0xff]  ;;  %v58_v59 = vld [vmem:[#allocation2 + $0x58] sm:$0xff]  ;;  %v183_v60 = vld [vmem:[#allocation5 + $0x280] sm:$0xff] }
  0x35   :  { %571 = vmatpush.msrb.mxu1 %v717_v61  ;;  %356 = vmatpush.msrb.mxu3 %v163_v62  ;;  %v65_v62 = vld [vmem:[#allocation2 + $0x90] sm:$0xff] }
  0x36   :  { %249 = vmatmul.f32.gmra.mxu0 %v54_v63  ;;  %261 = vmatmul.f32.gmra.mxu3 %v82_v2  ;;  %v98_v63 = vld [vmem:[#allocation2 + $0x198] sm:$0xff] }
  0x37   :  { %397 = vmatpush.msrb.mxu0 %v179_v1  ;;  %290 = vmatmul.f32.gmra.mxu1 %v55_v3  ;;  %v72_v1 = vld [vmem:[#allocation2 + $0xc8] sm:$0xff]  ;;  %v66_v2 = vld [vmem:[#allocation2 + $0x98] sm:$0xff]  ;;  %v53_v3 = vld [vmem:[#allocation2 + $0x30] sm:$0xff] }
  0x38   :  { %331 = vmatmul.f32.gmra.mxu2 %v56_v4  ;;  %357 = vmatpush.msrb.mxu3 %v162_v5  ;;  %v78_v4 = vld [vmem:[#allocation2 + $0xf8] sm:$0xff]  ;;  %v79_v5 = vld [vmem:[#allocation2 + $0x100] sm:$0xff] }
  0x39   :  { %398 = vmatpush.msrb.mxu0 %v178_v6  ;;  %572 = vmatpush.msrb.mxu1 %v724_v7  ;;  %v73_v6 = vld [vmem:[#allocation2 + $0xd0] sm:$0xff] }
  0x3a   :  { %358 = vmatpush.msrb.mxu3 %v161_v8  ;;  %v85_v8 = vld [vmem:[#allocation2 + $0x130] sm:$0xff] }
  0x3b   :  { %399 = vmatpush.msrb.mxu0 %v177_v9  ;;  %573 = vmatpush.msrb.mxu1 %v726_v10  ;;  %v86_v9 = vld [vmem:[#allocation2 + $0x138] sm:$0xff] }
  0x3c   :  { %359 = vmatpush.msrb.mxu3 %v160_v11  ;;  %v67_v11 = vld [vmem:[#allocation2 + $0xa0] sm:$0xff] }
  0x3d   :  { %400 = vmatpush.msrb.mxu0 %v176_v12  ;;  %574 = vmatpush.msrb.mxu1 %v729_v14  ;;  %v92_v12 = vld [vmem:[#allocation2 + $0x168] sm:$0xff] }
  0x3e   :  { %252 = vmatmul.f32.gmra.mxu0 %v61_v13  ;;  %360 = vmatpush.msrb.mxu3 %v159_v15  ;;  %v93_v13 = vld [vmem:[#allocation2 + $0x170] sm:$0xff]  ;;  %v74_v15 = vld [vmem:[#allocation2 + $0xd8] sm:$0xff] }
  0x3f   :  { %401 = vmatpush.msrb.mxu0 %v175_v16  ;;  %264 = vmatmul.f32.gmra.mxu3 %v89_v17  ;;  %v99_v16 = vld [vmem:[#allocation2 + $0x1a0] sm:$0xff]  ;;  %v100_v17 = vld [vmem:[#allocation2 + $0x1a8] sm:$0xff] }
  0x40   :  { %293 = vmatmul.f32.gmra.mxu1 %v62_v18  ;;  %334 = vmatmul.f32.gmra.mxu2 %v63_v19  ;;  %v94_v18 = vld [vmem:[#allocation2 + $0x178] sm:$0xff]  ;;  %v81_v19 = vld [vmem:[#allocation2 + $0x110] sm:$0xff] }
  0x41   :  { %361 = vmatpush.msrb.mxu3 %v158_v20  ;;  %402 = vmatpush.msrb.mxu0 %v174_v21  ;;  %v52_v20 = vld [vmem:[#allocation2 + $0x28] sm:$0xff]  ;;  %v95_v21 = vld [vmem:[#allocation2 + $0x180] sm:$0xff] }
  0x42   :  { %575 = vmatpush.msrb.mxu1 %v733_v22 }
  0x43   :  { %362 = vmatpush.msrb.mxu3 %v157_v23  ;;  %403 = vmatpush.msrb.mxu0 %v173_v24  ;;  %v88_v23 = vld [vmem:[#allocation2 + $0x148] sm:$0xff]  ;;  %v59_v24 = vld [vmem:[#allocation2 + $0x60] sm:$0xff] }
  0x44   :  { %576 = vmatpush.msrb.mxu1 %v735_v25 }
  0x45   :  { %363 = vmatpush.msrb.mxu3 %v156_v26  ;;  %404 = vmatpush.msrb.mxu0 %v172_v27  ;;  %v776_v26 = vld [vmem:[%s809_s2] ss:$0 sm:$0xff]  ;;  %s679_s2 = smov [#allocation7]  }
  0x46   :  { %577 = vmatpush.msrb.mxu1 %v738_v28  ;;  %255 = vmatmul.f32.gmra.mxu0 %v68_v30  ;;  %s529_s26 = sshll.u32 %s679_s2, 4  ;;  %s530_s26 = int_to_ptr.vmem [resolvable:$true] %s529_s26 }
  0x47   :  { %364 = vmatpush.msrb.mxu3 %v155_v29  ;;  %405 = vmatpush.msrb.mxu0 %v171_v31 }
  0x48   :  { %267 = vmatmul.f32.gmra.mxu3 %v96_v32  ;;  %296 = vmatmul.f32.gmra.mxu1 %v69_v33 }
  0x49   :  { %337 = vmatmul.f32.gmra.mxu2 %v70_v34  ;;  %365 = vmatpush.msrb.mxu3 %v154_v35 }
  0x4a   :  { %406 = vmatpush.msrb.mxu0 %v170_v36  ;;  %578 = vmatpush.msrb.mxu1 %v742_v37 }
  0x4b   :  { %366 = vmatpush.msrb.mxu3 %v153_v38 }
  0x4c   :  { %407 = vmatpush.msrb.mxu0 %v169_v39  ;;  %579 = vmatpush.msrb.mxu1 %v744_v40 }
  0x4d   :  { %367 = vmatpush.msrb.mxu3 %v152_v41 }
  0x4e   :  { %408 = vmatpush.msrb.mxu0 %v168_v42  ;;  %580 = vmatpush.msrb.mxu1 %v747_v43 }
  0x4f   :  { %368 = vmatpush.msrb.mxu3 %v151_v44 }
  0x50   :  { %409 = vmatpush.msrb.mxu0 %v167_v45  ;;  %299 = vmatmul.f32.gmra.mxu1 %v76_v46 }
  0x51   :  { %340 = vmatmul.f32.gmra.mxu2 %v77_v47  ;;  %369 = vmatmul.f32.vlgmr.msrb.gmra.mxu3 %v50_v48 }
  0x52   :  { %410 = vmatmul.f32.vlgmr.msrb.gmra.mxu0 %v51_v49  ;;  %585 = vmatpush.msra.mxu3 %v709_v53  ;;  %v90_v53 = vld [vmem:[#allocation2 + $0x158] sm:$0xff] }
  0x53   :  { %435 = vmatpush.msra.mxu0 %v711_v55  ;;  %581 = vmatpush.msrb.mxu1 %v186_v50  ;;  %v91_v55 = vld [vmem:[#allocation2 + $0x160] sm:$0xff] }
  0x54   :  { %586 = vmatpush.msra.mxu3 %v720_v0  ;;  %v71_v0 = vld [vmem:[#allocation2 + $0xc0] sm:$0xff] }
  0x55   :  { %436 = vmatpush.msra.mxu0 %v714_v58  ;;  %582 = vmatpush.msrb.mxu1 %v185_v51  ;;  %v64_v58 = vld [vmem:[#allocation2 + $0x88] sm:$0xff] }
  0x57   :  { %437 = vmatpush.msra.mxu0 %v717_v61  ;;  %583 = vmatpush.msrb.mxu1 %v184_v52  ;;  %v97_v61 = vld [vmem:[#allocation2 + $0x190] sm:$0xff] }
  0x58   :  { %302 = vmatmul.f32.gmra.mxu1 %v83_v54 }
  0x59   :  { %343 = vmatmul.f32.gmra.mxu2 %v84_v56  ;;  %372 = vmatmul.f32.gmra.mxu3 %v57_v57 }
  0x5a   :  { %413 = vmatmul.f32.gmra.mxu0 %v58_v59  ;;  %584 = vmatpush.msrb.mxu1 %v183_v60 }
  0x5b   :  { %438 = vmatpush.msra.mxu0 %v724_v7  ;;  %v60_v7 = vld [vmem:[#allocation2 + $0x68] sm:$0xff] }
  0x5d   :  { %439 = vmatpush.msra.mxu0 %v726_v10  ;;  %v80_v10 = vld [vmem:[#allocation2 + $0x108] sm:$0xff] }
  0x5f   :  { %440 = vmatpush.msra.mxu0 %v729_v14  ;;  %v87_v14 = vld [vmem:[#allocation2 + $0x140] sm:$0xff] }
  0x60   :  { %305 = vmatmul.f32.gmra.mxu1 %v90_v53 }
  0x61   :  { %346 = vmatmul.f32.gmra.mxu2 %v91_v55  ;;  %375 = vmatmul.f32.gmra.mxu3 %v64_v58 }
  0x62   :  { %416 = vmatmul.f32.gmra.mxu0 %v65_v62 }
  0x63   :  { %441 = vmatpush.msra.mxu0 %v733_v22  ;;  %v101_v22 = vld [vmem:[#allocation2 + $0x1b0] sm:$0xff] }
  0x65   :  { %442 = vmatpush.msra.mxu0 %v735_v25  ;;  %v102_v25 = vld [vmem:[#allocation2 + $0x1b8] sm:$0xff] }
  0x67   :  { %443 = vmatpush.msra.mxu0 %v738_v28 }
  0x68   :  { %308 = vmatmul.f32.gmra.mxu1 %v97_v61 }
  0x69   :  { %349 = vmatmul.f32.gmra.mxu2 %v98_v63  ;;  %378 = vmatmul.f32.gmra.mxu3 %v71_v0 }
  0x6a   :  { %419 = vmatmul.f32.gmra.mxu0 %v72_v1 }
  0x6b   :  { %444 = vmatpush.msra.mxu0 %v742_v37 }
  0x6d   :  { %445 = vmatpush.msra.mxu0 %v744_v40 }
  0x6f   :  { %446 = vmatpush.msra.mxu0 %v747_v43 }
  0x70   :  { %457 = vmatmul.f32.vlgmr.msrb.gmra.mxu1 %v66_v2 }
  0x71   :  { %545 = vmatmul.msk.f32.vlgmr.msrb.gmra.mxu2 %vm205_vm0, %v53_v3  ;;  %381 = vmatmul.f32.gmra.mxu3 %v78_v4 }
  0x72   :  { %422 = vmatmul.f32.gmra.mxu0 %v79_v5 }
  0x73   :  { %447 = vmatpush.msra.mxu0 %v186_v50 }
  0x75   :  { %448 = vmatpush.msra.mxu0 %v185_v51 }
  0x77   :  { %449 = vmatpush.msra.mxu0 %v184_v52 }
  0x78   :  { %460 = vmatmul.f32.gmra.mxu1 %v73_v6 }
  0x79   :  { %546 = vmatmul.msk.f32.gmra.mxu2 %vm205_vm0, %v60_v7  ;;  %384 = vmatmul.f32.gmra.mxu3 %v85_v8 }
  0x7a   :  { %425 = vmatmul.f32.gmra.mxu0 %v86_v9 }
  0x7b   :  { %450 = vmatpush.msra.mxu0 %v183_v60 }
  0x80   :  { %463 = vmatmul.f32.gmra.mxu1 %v80_v10 }
  0x81   :  { %547 = vmatmul.msk.f32.gmra.mxu2 %vm205_vm0, %v67_v11  ;;  %387 = vmatmul.f32.gmra.mxu3 %v92_v12 }
  0x82   :  { %428 = vmatmul.f32.gmra.mxu0 %v93_v13 }
  0x88   :  { %466 = vmatmul.f32.gmra.mxu1 %v87_v14 }
  0x89   :  { %548 = vmatmul.msk.f32.gmra.mxu2 %vm205_vm0, %v74_v15  ;;  %390 = vmatmul.f32.gmra.mxu3 %v99_v16 }
  0x8a   :  { %431 = vmatmul.f32.gmra.mxu0 %v100_v17 }
  0x90   :  { %469 = vmatmul.f32.gmra.mxu1 %v94_v18 }
  0x91   :  { %549 = vmatmul.msk.f32.gmra.mxu2 %vm205_vm0, %v81_v19  ;;  %551 = vmatmul.msk.f32.vlgmr.msra.gmra.mxu3 %vm205_vm0, %v95_v21 }
  0x92   :  { %451 = vmatmul.f32.vlgmr.msra.gmra.mxu0 %v52_v20 }
  0x98   :  { %472 = vmatmul.f32.gmra.mxu1 %v101_v22 }
  0x99   :  { %550 = vmatmul.msk.f32.gmra.mxu2 %vm205_vm0, %v88_v23  ;;  %552 = vmatmul.msk.f32.gmra.mxu3 %vm205_vm0, %v102_v25 }
  0x9a   :  { %454 = vmatmul.f32.gmra.mxu0 %v59_v24 }
  0xaa   :  { %v247_v27 = vpop.f32.mrf.mxu0 }
  0xab   :  { %v248_v28 = vadd.f32 %v776_v26, %v247_v27  ;;  %v288_v29 = vpop.f32.mrf.mxu1 }
  0xad   :  { %v289_v30 = vadd.f32 %v288_v29, %v248_v28 }
  0xb1   :  { %v259_v31 = vpop.f32.mrf.mxu3 }
  0xb2   :  { %v329_v32 = vpop.f32.mrf.mxu2  ;;  %v260_v25 = vadd.f32 %v776_v26, %v259_v31 }
  0xb3   :  { %v330_v33 = vadd.f32 %v329_v32, %v289_v30  ;;  %v250_v34 = vpop.f32.mrf.mxu0 }
  0xb4   :  { %v251_v35 = vadd.f32 %v776_v26, %v250_v34  ;;  %v291_v36 = vpop.f32.mrf.mxu1 }
  0xb6   :  { %v292_v37 = vadd.f32 %v291_v36, %v251_v35 }
  0xb9   :  { %v780_v38 = vpop.f32.mrf.mxu3 }
  0xba   :  { %v263_v31 = vadd.f32 %v776_v26, %v780_v38 }
  0xbb   :  { %v332_v39 = vpop.f32.mrf.mxu2  ;;  %v253_v40 = vpop.f32.mrf.mxu0 }
  0xbc   :  { %v782_v41 = vadd.f32 %v332_v39, %v292_v37  ;;  %v254_v3 = vadd.f32 %v776_v26, %v253_v40 }
  0xbd   :  { %v294_v42 = vpop.f32.mrf.mxu1 }
  0xbe   :  { %v295_v7 = vadd.f32 %v294_v42, %v254_v3 }
  0xc2   :  { %v265_v43 = vpop.f32.mrf.mxu3 }
  0xc3   :  { %v335_v44 = vpop.f32.mrf.mxu2  ;;  %v256_v45 = vpop.f32.mrf.mxu0  ;;  %v266_v28 = vadd.f32 %v776_v26, %v265_v43 }
  0xc4   :  { %v336_v9 = vadd.f32 %v335_v44, %v295_v7  ;;  %v257_v10 = vadd.f32 %v776_v26, %v256_v45 }
  0xc5   :  { %v297_v46 = vpop.f32.mrf.mxu1 }
  0xc6   :  { %v298_v15 = vadd.f32 %v297_v46, %v257_v10 }
  0xcb   :  { %v784_v47 = vpop.f32.mrf.mxu3 }
  0xcc   :  { %v338_v48 = vpop.f32.mrf.mxu2  ;;  %v269_v43 = vadd.f32 %v776_v26, %v784_v47 }
  0xcd   :  { %v300_v49 = vpop.f32.mrf.mxu1  ;;  %v339_v18 = vadd.f32 %v338_v48, %v298_v15 }
  0xce   :  { %v301_v29 = vadd.f32 %v300_v49, %v260_v25 }
  0xcf   :  { %v411_v50 = vpop.f32.mrf.mxu0 }
  0xd4   :  { %v341_v51 = vpop.f32.mrf.mxu2  ;;  %v370_v52 = vpop.f32.mrf.mxu3 }
  0xd5   :  { %v303_v54 = vpop.f32.mrf.mxu1  ;;  %v371_v32 = vadd.f32 %v370_v52, %v330_v33  ;;  %v342_v35 = vadd.f32 %v341_v51, %v301_v29 }
  0xd6   :  { %v304_v49 = vadd.f32 %v303_v54, %v263_v31 }
  0xd7   :  { %v786_v56 = vpop.f32.mrf.mxu0  ;;  %v412_v46 = vadd.f32 %v411_v50, %v371_v32 }
  0xdc   :  { %v788_v57 = vpop.f32.mrf.mxu2  ;;  %v373_v59 = vpop.f32.mrf.mxu3 }
  0xdd   :  { %v306_v60 = vpop.f32.mrf.mxu1  ;;  %v374_v52 = vadd.f32 %v373_v59, %v782_v41 }
  0xde   :  { %v307_v34 = vadd.f32 %v306_v60, %v266_v28 }
  0xdf   :  { %v417_v53 = vpop.f32.mrf.mxu0  ;;  %v415_v47 = vadd.f32 %v786_v56, %v374_v52 }
  0xe4   :  { %v347_v55 = vpop.f32.mrf.mxu2  ;;  %v376_v58 = vpop.f32.mrf.mxu3 }
  0xe5   :  { %v309_v62 = vpop.f32.mrf.mxu1  ;;  %v377_v12 = vadd.f32 %v376_v58, %v336_v9  ;;  %v348_v37 = vadd.f32 %v347_v55, %v307_v34 }
  0xe6   :  { %v310_v60 = vadd.f32 %v309_v62, %v269_v43 }
  0xe7   :  { %v420_v61 = vpop.f32.mrf.mxu0  ;;  %v418_v17 = vadd.f32 %v417_v53, %v377_v12 }
  0xec   :  { %v350_v63 = vpop.f32.mrf.mxu2  ;;  %v379_v0 = vpop.f32.mrf.mxu3 }
  0xed   :  { %v458_v1 = vpop.f32.mrf.mxu1  ;;  %v380_v21 = vadd.f32 %v379_v0, %v339_v18  ;;  %v351_v0 = vadd.f32 %v350_v63, %v310_v60 }
  0xee   :  { %v459_v19 = vadd.f32 %v458_v1, %v418_v17 }
  0xef   :  { %v423_v2 = vpop.f32.mrf.mxu0  ;;  %v421_v30 = vadd.f32 %v420_v61, %v380_v21  ;;  %v345_v61 = vadd.f32 %v788_v57, %v304_v49 }
  0xf4   :  { %v493_v4 = vpop.f32.mrf.mxu2  ;;  %v382_v5 = vpop.f32.mrf.mxu3 }
  0xf5   :  { %v461_v6 = vpop.f32.mrf.mxu1  ;;  %v383_v40 = vadd.f32 %v382_v5, %v342_v35 }
  0xf6   :  { %v462_v36 = vadd.f32 %v461_v6, %v421_v30 }
  0xf7   :  { %v426_v8 = vpop.f32.mrf.mxu0  ;;  %v424_v51 = vadd.f32 %v423_v2, %v383_v40 }
  0xfc   :  { %v496_v11 = vpop.f32.mrf.mxu2  ;;  %v385_v13 = vpop.f32.mrf.mxu3 }
  0xfd   :  { %v464_v14 = vpop.f32.mrf.mxu1  ;;  %v386_v3 = vadd.f32 %v385_v13, %v345_v61 }
  0xfe   :  { %v465_v50 = vadd.f32 %v464_v14, %v424_v51 }
  0xff   :  { %v429_v16 = vpop.f32.mrf.mxu0  ;;  %v427_v59 = vadd.f32 %v426_v8, %v386_v3 }
 0x104   :  { %v499_v20 = vpop.f32.mrf.mxu2  ;;  %v388_v22 = vpop.f32.mrf.mxu3 }
 0x105   :  { %v500_v23 = vadd.f32 %v499_v20, %v459_v19  ;;  %v467_v24 = vpop.f32.mrf.mxu1  ;;  %v389_v45 = vadd.f32 %v388_v22, %v348_v37 }
 0x107   :  { %519 = vst [vmem:[#allocation7 + $0x10] sm:$0xff] %v500_v23  ;;  %v432_v27 = vpop.f32.mrf.mxu0  ;;  %v430_v58 = vadd.f32 %v429_v16, %v389_v45 }
 0x10c   :  { %v502_v39 = vpop.f32.mrf.mxu2  ;;  %v391_v42 = vpop.f32.mrf.mxu3 }
 0x10d   :  { %v503_v44 = vadd.f32 %v502_v39, %v462_v36  ;;  %v470_v53 = vpop.f32.mrf.mxu1  ;;  %v392_v7 = vadd.f32 %v391_v42, %v351_v0 }
 0x10e   :  { %v471_v38 = vadd.f32 %v470_v53, %v430_v58 }
 0x10f   :  { %520 = vst [vmem:[#allocation7 + $0x18] sm:$0xff] %v503_v44  ;;  %v452_v48 = vpop.f32.mrf.mxu0  ;;  %v433_v57 = vadd.f32 %v432_v27, %v392_v7 }
 0x110   :  { %v453_v33 = vadd.f32 %v452_v48, %v412_v46 }
 0x112   :  { %v494_v55 = vadd.f32 %v493_v4, %v453_v33  ;;  %v468_v4 = vadd.f32 %v467_v24, %v427_v59 }
 0x114   :  { %517 = vst [vmem:[#allocation7] sm:$0xff] %v494_v55  ;;  %v505_v1 = vpop.f32.mrf.mxu2  ;;  %v511_v6 = vpop.f32.mrf.mxu3 }
 0x115   :  { %v506_v5 = vadd.f32 %v505_v1, %v465_v50  ;;  %v512_v26 = vadd.f32 %v511_v6, %v471_v38  ;;  %v473_v62 = vpop.f32.mrf.mxu1 }
 0x116   :  { %v474_v63 = vadd.f32 %v473_v62, %v433_v57 }
 0x117   :  { %521 = vst [vmem:[#allocation7 + $0x20] sm:$0xff] %v506_v5  ;;  %v455_v54 = vpop.f32.mrf.mxu0 }
 0x118   :  { %523 = vst [vmem:[#allocation7 + $0x30] sm:$0xff] %v512_v26  ;;  %v456_v41 = vadd.f32 %v455_v54, %v415_v47 }
 0x11a   :  { %v497_v2 = vadd.f32 %v496_v11, %v456_v41 }
 0x11c   :  { %518 = vst [vmem:[#allocation7 + $0x8] sm:$0xff] %v497_v2  ;;  %v508_v9 = vpop.f32.mrf.mxu2  ;;  %v514_v56 = vpop.f32.mrf.mxu3 }
 0x11d   :  { %v509_v10 = vadd.f32 %v508_v9, %v468_v4  ;;  %v515_v12 = vadd.f32 %v514_v56, %v474_v63 }
 0x11f   :  { %522 = vst [vmem:[#allocation7 + $0x28] sm:$0xff] %v509_v10 }
 0x120   :  { %524 = vst [vmem:[#allocation7 + $0x38] sm:$0xff] %v515_v12 }
 0x121   :  { %537 = dma.vmem_to_hbm [thread:$0]  %s530_s26, 1024, %s532_s29, [#allocation4], %s677_s24, %s677_s24, %s678_s25  }
 0x122   :  { %671 = dma.done.wait [#allocation4], 1024  }
 0x123   :  { %672 = vsyncadd [#allocation4], 4294966272 }
 0x124   :  { %542 = vsyncpa [#allocation3], 1 }
 0x125   :  { %543 = vsyncpa [#allocation6], 1 }
 0x126   :  { %544 = vsyncpa [#allocation4], 1 }

</bundles_post_ra>
